<compile_context>
chip_gen: v6e
topology: v6e:2x2x1
jax: 0.10.0
libtpu: 0.0.40
codegen_flags: <defaults>
</compile_context>

<pallas_src>
import functools

import jax
import jax.numpy as jnp
from jax.experimental import pallas as pl
from jax.experimental.pallas import tpu as pltpu


_DEF_BLOCK_BYTES = 2 << 20  # conservative per-block budget across v5e/v6e/v7x


def _cdiv(a, b):
    return -(-a // b)


def _sublane(itemsize):
    # sub-32-bit dtypes pack along sublanes
    return {1: 32, 2: 16}.get(itemsize, 8)


# --------------------------------------------------------------------------
# Row-resident path: one block holds whole spatial planes for `tbc` instances.
# --------------------------------------------------------------------------

def _adain_rows_kernel(x_ref, wb_ref, o_ref, *, tbc, hw_true, eps):
    # x_ref, o_ref: (tbc, HW_eff); wb_ref: (n_blocks*tbc, 2), VMEM-resident.
    i = pl.program_id(0)
    start = i * tbc
    if tbc % 8 == 0:
        start = pl.multiple_of(start, 8)
    wb = wb_ref[pl.ds(start, tbc), :].astype(jnp.float32)   # (tbc, 2)
    gamma = wb[:, 0:1]
    beta = wb[:, 1:2]

    # Single-pass stats, f32 accumulation.  Any zero lane-padding contributes 0
    # to both sums; the divisor is the true spatial size.
    inv_n = 1.0 / hw_true
    xf = x_ref[...].astype(jnp.float32)
    mean = jnp.sum(xf, axis=-1, keepdims=True) * inv_n
    ex2 = jnp.sum(xf * xf, axis=-1, keepdims=True) * inv_n
    var = jnp.maximum(ex2 - mean * mean, 0.0)   # clamp guards f32 cancellation
    s = gamma * jax.lax.rsqrt(var + eps)        # (tbc, 1)
    t = beta - mean * s                         # (tbc, 1)

    # Re-read x_ref for the fused scale/shift instead of reusing the cached
    # f32 copy (keeps only (tbc,1) values live across the stats->apply edge).
    o_ref[...] = (x_ref[...].astype(jnp.float32) * s + t).astype(o_ref.dtype)


def _pick_tbc(bc, hw, itemsize, *, target_bytes, min_blocks=2):
    sub = _sublane(itemsize)
    if bc <= sub:
        return bc                     # full second-minor dim: always legal
    # Largest sublane-aligned row count whose (rows, hw) block fits the budget.
    rows = max(sub, (target_bytes // max(hw * itemsize, 1)) // sub * sub)
    # Keep >= min_blocks grid steps so the parallel axis can be sharded across
    # v7x's two TensorCores (near-neutral on single-TC v5e/v6e).
    if min_blocks > 1:
        rows = min(rows, max(sub, _cdiv(_cdiv(bc, min_blocks), sub) * sub))
    if rows >= bc:
        return bc
    return rows


def _adain_rows(x_flat, wb, hw_true, eps, tbc):
    bc, hw_eff = x_flat.shape
    n_blocks = _cdiv(bc, tbc)
    pad_rows = n_blocks * tbc - bc
    if pad_rows:
        wb = jnp.pad(wb, ((0, pad_rows), (0, 0)))
    kernel = functools.partial(_adain_rows_kernel, tbc=tbc, hw_true=hw_true, eps=eps)
    itemsize = x_flat.dtype.itemsize
    return pl.pallas_call(
        kernel,
        out_shape=jax.ShapeDtypeStruct((bc, hw_eff), x_flat.dtype),
        grid=(n_blocks,),
        in_specs=[
            pl.BlockSpec((tbc, hw_eff), lambda i: (i, 0)),          # x rows
            pl.BlockSpec((n_blocks * tbc, 2), lambda i: (0, 0)),    # wb resident
        ],
        out_specs=pl.BlockSpec((tbc, hw_eff), lambda i: (i, 0)),
        compiler_params=pltpu.CompilerParams(dimension_semantics=("parallel",)),
        cost_estimate=pl.CostEstimate(
            flops=7 * bc * hw_eff,
            transcendentals=bc,
            bytes_accessed=2 * bc * hw_eff * itemsize,
        ),
    )(x_flat, wb)


# --------------------------------------------------------------------------
# Fallback path for large spatial planes: HW-tiled stats pass + apply pass.
# --------------------------------------------------------------------------

def _stats_kernel(x_ref, wb_ref, scale_ref, shift_ref, s1, s2, *, thw, hw_true, eps):
    j = pl.program_id(1)

    @pl.when(j == 0)
    def _():
        s1[...] = jnp.zeros_like(s1)
        s2[...] = jnp.zeros_like(s2)

    xf = x_ref[...].astype(jnp.float32)
    # Mask lanes past the true spatial extent (ragged last HW block).
    col = j * thw + jax.lax.broadcasted_iota(jnp.int32, xf.shape, 1)
    xf = jnp.where(col < hw_true, xf, 0.0)
    s1[...] += jnp.sum(xf, axis=-1, keepdims=True)
    s2[...] += jnp.sum(xf * xf, axis=-1, keepdims=True)

    @pl.when(j == pl.num_programs(1) - 1)
    def _():
        inv_n = 1.0 / hw_true
        mean = s1[...] * inv_n
        var = jnp.maximum(s2[...] * inv_n - mean * mean, 0.0)
        wb = wb_ref[...].astype(jnp.float32)
        sc = wb[:, 0:1] * jax.lax.rsqrt(var + eps)
        scale_ref[...] = sc
        shift_ref[...] = wb[:, 1:2] - mean * sc


def _apply_kernel(x_ref, scale_ref, shift_ref, o_ref):
    o_ref[...] = (x_ref[...].astype(jnp.float32) * scale_ref[...]
                  + shift_ref[...]).astype(o_ref.dtype)


def _adain_hw_tiled(x_flat, wb, hw_true, eps, tbc, thw):
    bc, hw_eff = x_flat.shape
    itemsize = x_flat.dtype.itemsize
    n_i = _cdiv(bc, tbc)
    n_j = _cdiv(hw_eff, thw)

    stats_kernel = functools.partial(_stats_kernel, thw=thw, hw_true=hw_true, eps=eps)
    scale, shift = pl.pallas_call(
        stats_kernel,
        out_shape=(jax.ShapeDtypeStruct((bc, 1), jnp.float32),
                   jax.ShapeDtypeStruct((bc, 1), jnp.float32)),
        grid=(n_i, n_j),
        in_specs=[
            pl.BlockSpec((tbc, thw), lambda i, j: (i, j)),
            pl.BlockSpec((tbc, 2), lambda i, j: (i, 0)),
        ],
        out_specs=(pl.BlockSpec((tbc, 1), lambda i, j: (i, 0)),
                   pl.BlockSpec((tbc, 1), lambda i, j: (i, 0))),
        scratch_shapes=[pltpu.VMEM((tbc, 1), jnp.float32),
                        pltpu.VMEM((tbc, 1), jnp.float32)],
        compiler_params=pltpu.CompilerParams(
            dimension_semantics=("parallel", "arbitrary")),
        cost_estimate=pl.CostEstimate(
            flops=4 * bc * hw_eff, transcendentals=bc,
            bytes_accessed=bc * hw_eff * itemsize),
    )(x_flat, wb)

    return pl.pallas_call(
        _apply_kernel,
        out_shape=jax.ShapeDtypeStruct((bc, hw_eff), x_flat.dtype),
        grid=(n_i, n_j),
        in_specs=[
            pl.BlockSpec((tbc, thw), lambda i, j: (i, j)),
            pl.BlockSpec((tbc, 1), lambda i, j: (i, 0)),
            pl.BlockSpec((tbc, 1), lambda i, j: (i, 0)),
        ],
        out_specs=pl.BlockSpec((tbc, thw), lambda i, j: (i, j)),
        compiler_params=pltpu.CompilerParams(
            dimension_semantics=("parallel", "parallel")),
        cost_estimate=pl.CostEstimate(
            flops=2 * bc * hw_eff, transcendentals=0,
            bytes_accessed=2 * bc * hw_eff * itemsize),
    )(x_flat, scale, shift)


# --------------------------------------------------------------------------
# Public wrapper
# --------------------------------------------------------------------------

def adaptive_instance_norm_2d(x, weight, bias, *, eps=1e-5,
                              block_bytes=_DEF_BLOCK_BYTES,
                              force_hw_tiling=False):
    """x: (B, C, H, W); weight, bias: (B*C,). Returns (B, C, H, W)."""
    B, C, H, W = x.shape
    BC, HW = B * C, H * W
    itemsize = x.dtype.itemsize
    sub = _sublane(itemsize)

    # weight/bias fused into one small (BC, 2) array (one resident VMEM block).
    wb = jnp.stack([weight, bias], axis=-1)

    # Lane-dense layout: one instance = one row of H*W elements.
    x_flat = x.reshape(BC, HW)

    # Small, lane-misaligned spatial planes (7x7, 14x14, ...): zero-pad HW to a
    # multiple of 128 so stores stay unmasked; zeros don't perturb the sums and
    # the divisor stays the true HW.  Skipped for large planes (pad copy would
    # cost more than the masked-tail waste it removes).
    pad_cols = (-HW) % 128
    if pad_cols and HW < 1024 and not force_hw_tiling:
        x_flat = jnp.pad(x_flat, ((0, 0), (0, pad_cols)))
    hw_eff = x_flat.shape[1]

    min_row_block = min(sub, BC) * hw_eff * itemsize
    if force_hw_tiling or min_row_block > block_bytes:
        # Even the minimum row block doesn't fit the budget (very large H*W):
        # two-pass stats/apply kernels tiled over the spatial axis.
        tbc = min(sub, BC)
        thw = max(128, (block_bytes // max(tbc * itemsize, 1)) // 128 * 128)
        thw = min(thw, hw_eff)
        out_flat = _adain_hw_tiled(x_flat, wb, HW, eps, tbc, thw)
    else:
        tbc = _pick_tbc(BC, hw_eff, itemsize, target_bytes=block_bytes, min_blocks=2)
        out_flat = _adain_rows(x_flat, wb, HW, eps, tbc)

    if hw_eff != HW:
        out_flat = out_flat[:, :HW]
    return out_flat.reshape(B, C, H, W)


# --------------------------------------------------------------------------
# Reference + self-test
# --------------------------------------------------------------------------

def _reference(x, weight, bias, eps=1e-5):
    B, C, H, W = x.shape
    xr = x.reshape(B * C, H * W).astype(jnp.float32)
    mean = xr.mean(axis=1, keepdims=True)
    var = ((xr - mean) ** 2).mean(axis=1, keepdims=True)
    y = (xr - mean) / jnp.sqrt(var + eps)
    y = y * weight[:, None] + bias[:, None]
    return y.reshape(B, C, H, W).astype(x.dtype)


if __name__ == "__main__":
    key = jax.random.PRNGKey(0)
    kx, kw, kb = jax.random.split(key, 3)

    B, C, H, W = 2, 4, 16, 16
    x = jax.random.normal(kx, (B, C, H, W), dtype=jnp.float32)
    # AdaIN weight/bias are assigned externally before forward; shape (B*C,).
    weight = jax.random.normal(kw, (B * C,), dtype=jnp.float32) * 0.5 + 1.0
    bias = jax.random.normal(kb, (B * C,), dtype=jnp.float32) * 0.1

    ref = _reference(x, weight, bias, eps=1e-5)

    # 1) Main row-resident path.
    out = jax.block_until_ready(adaptive_instance_norm_2d(x, weight, bias, eps=1e-5))
    assert out.shape == (B, C, H, W)
    assert jnp.allclose(out, ref, atol=1e-4, rtol=1e-4)

    # 2) Large-spatial fallback path (HW-tiled stats + apply), forced at small shape.
    out2 = jax.block_until_ready(
        adaptive_instance_norm_2d(x, weight, bias, eps=1e-5,
                                  block_bytes=8 * 128 * 4, force_hw_tiling=True))
    assert jnp.allclose(out2, ref, atol=1e-4, rtol=1e-4)

    # 3) Small lane-misaligned spatial plane (exercises host-side HW padding).
    x3 = jax.random.normal(kb, (B, C, 7, 7), dtype=jnp.float32)
    out3 = jax.block_until_ready(adaptive_instance_norm_2d(x3, weight, bias, eps=1e-5))
    ref3 = _reference(x3, weight, bias, eps=1e-5)
    assert jnp.allclose(out3, ref3, atol=1e-4, rtol=1e-4)

    print("KERNEL_OK")
</pallas_src>

<mosaic_0001>
module attributes {stable_mosaic.version = 11 : i64} {
  func.func @_adain_rows_kernel(%arg0: i32, %arg1: memref<8x256xf32, #tpu.memory_space<vmem>>, %arg2: memref<8x2xf32, #tpu.memory_space<vmem>>, %arg3: memref<8x256xf32, #tpu.memory_space<vmem>>) attributes {dimension_semantics = [#tpu.dimension_semantics<parallel>], iteration_bounds = array<i64: 1>, scalar_prefetch = 0 : i64, scratch_operands = 0 : i64, tpu.core_type = #tpu.core_type<tc>, window_params = [{transform_indices = @transform_0, window_bounds = array<i64: 8, 256>}, {pipeline_mode = #tpu.pipeline_mode<synchronous>, transform_indices = @transform_1, window_bounds = array<i64: 8, 2>}, {transform_indices = @transform_2, window_bounds = array<i64: 8, 256>}]} {
    %c8_i32 = arith.constant 8 : i32
    %0 = arith.muli %arg0, %c8_i32 : i32
    %1 = tpu.assume_multiple %0, 8 : i32
    %2 = arith.index_cast %1 : i32 to index
    %c0 = arith.constant 0 : index
    %3 = vector.load %arg2[%2, %c0] : memref<8x2xf32, #tpu.memory_space<vmem>>, vector<8x2xf32>
    %4 = vector.extract_strided_slice %3 {offsets = [0, 0], sizes = [8, 1], strides = [1, 1]} : vector<8x2xf32> to vector<8x1xf32>
    %5 = vector.extract_strided_slice %3 {offsets = [0, 1], sizes = [8, 1], strides = [1, 1]} : vector<8x2xf32> to vector<8x1xf32>
    %c0_0 = arith.constant 0 : index
    %c0_1 = arith.constant 0 : index
    %6 = vector.load %arg1[%c0_0, %c0_1] : memref<8x256xf32, #tpu.memory_space<vmem>>, vector<8x256xf32>
    %cst = arith.constant dense<0.000000e+00> : vector<8xf32>
    %7 = vector.multi_reduction <add>, %6, %cst [1] : vector<8x256xf32> to vector<8xf32>
    %8 = vector.shape_cast %7 : vector<8xf32> to vector<8x1xf32>
    %cst_2 = arith.constant 3.906250e-03 : f32
    %9 = vector.broadcast %cst_2 : f32 to vector<8x1xf32>
    %10 = arith.mulf %8, %9 : vector<8x1xf32>
    %11 = arith.mulf %6, %6 : vector<8x256xf32>
    %cst_3 = arith.constant dense<0.000000e+00> : vector<8xf32>
    %12 = vector.multi_reduction <add>, %11, %cst_3 [1] : vector<8x256xf32> to vector<8xf32>
    %13 = vector.shape_cast %12 : vector<8xf32> to vector<8x1xf32>
    %cst_4 = arith.constant 3.906250e-03 : f32
    %14 = vector.broadcast %cst_4 : f32 to vector<8x1xf32>
    %15 = arith.mulf %13, %14 : vector<8x1xf32>
    %16 = arith.mulf %10, %10 : vector<8x1xf32>
    %17 = arith.subf %15, %16 : vector<8x1xf32>
    %cst_5 = arith.constant 0.000000e+00 : f32
    %18 = vector.broadcast %cst_5 : f32 to vector<8x1xf32>
    %19 = arith.maximumf %17, %18 : vector<8x1xf32>
    %cst_6 = arith.constant 9.99999974E-6 : f32
    %20 = vector.broadcast %cst_6 : f32 to vector<8x1xf32>
    %21 = arith.addf %19, %20 : vector<8x1xf32>
    %22 = math.rsqrt %21 : vector<8x1xf32>
    %23 = arith.mulf %4, %22 : vector<8x1xf32>
    %24 = arith.mulf %10, %23 : vector<8x1xf32>
    %25 = arith.subf %5, %24 : vector<8x1xf32>
    %c0_7 = arith.constant 0 : index
    %c0_8 = arith.constant 0 : index
    %26 = vector.load %arg1[%c0_7, %c0_8] : memref<8x256xf32, #tpu.memory_space<vmem>>, vector<8x256xf32>
    %27 = vector.broadcast %23 : vector<8x1xf32> to vector<8x256xf32>
    %28 = arith.mulf %26, %27 : vector<8x256xf32>
    %29 = vector.broadcast %25 : vector<8x1xf32> to vector<8x256xf32>
    %30 = arith.addf %28, %29 : vector<8x256xf32>
    %c0_9 = arith.constant 0 : index
    %c0_10 = arith.constant 0 : index
    %31 = vector.load %arg3[%c0_9, %c0_10] : memref<8x256xf32, #tpu.memory_space<vmem>>, vector<8x256xf32>
    tpu.vector_store %arg3[%c0_9, %c0_10], %30 {strides = array<i32>} : memref<8x256xf32, #tpu.memory_space<vmem>>, vector<8x256xf32>,
    return
  }
  func.func @transform_0(%arg0: i32) -> (i32, i32) {
    %c0_i32 = arith.constant 0 : i32
    %c0_i32_0 = arith.constant 0 : i32
    return %arg0, %c0_i32 : i32, i32
  }
  func.func @transform_1(%arg0: i32) -> (i32, i32) {
    %c0_i32 = arith.constant 0 : i32
    %c0_i32_0 = arith.constant 0 : i32
    %c0_i32_1 = arith.constant 0 : i32
    return %c0_i32, %c0_i32_0 : i32, i32
  }
  func.func @transform_2(%arg0: i32) -> (i32, i32) {
    %c0_i32 = arith.constant 0 : i32
    %c0_i32_0 = arith.constant 0 : i32
    return %arg0, %c0_i32 : i32, i32
  }
}

</mosaic_0001>

<bundles_post_ra>
// kernel: tpu_custom_call.1
= control target key start
LH: loop header
LB: loop body
LE: loop exit
PB: predicated region body
PF: predicated region fallthrough
CT: control target
= control target key end

     0   :  { %7 = vsyncpa [#allocation3], 0  ;;  %s164_s0 = inlined_call_operand.hbm [shape: f32[8,256], index: 0, kind: input, shape index: {}]   ;;  %s165_s1 = inlined_call_operand.vmem [shape: f32[8,2], index: 1, kind: input, shape index: {}]   ;;  %s166_s2 = inlined_call_operand.hbm [shape: f32[8,256], index: 2, kind: output, shape index: {}]  }
   0x1   :  { %8 = vsyncpa [#allocation4], 0  ;;  %s135_s9 = smov [#allocation2]  }
   0x2   :  { %s15_s10 = sshll.u32 %s135_s9, 4  ;;  %s16_s10 = int_to_ptr.vmem [resolvable:$true] %s15_s10 }
   0x3   :  { %s99_s11 = scalar_lea.vmem %s16_s10, 256  ;;  %p104_p1 = scmp.lt.s32.totalorder %s16_s10, %s16_s10 }
   0x4   :  { %p100_p0 = scmp.ne.s32.totalorder %s16_s10, %s99_s11  ;;  %p105_p2 = scmp.lt.s32.totalorder %s99_s11, %s99_s11 }
   0x6   :  { %p106_p3 = por %p105_p2, %p104_p1 }
   0x8   :  { %p107_p4 = pnand %p106_p3, %p100_p0 }
   0xa   :  { %110 = shalt.err (!%p107_p4)
}
   0xb   :  { %18 = dma.hbm_to_vmem [thread:$0]  %s164_s0, 256, %s16_s10, [#allocation3]  }
   0xc   :  { %131 = dma.done.wait [#allocation3], 256  }
   0xd   :  { %132 = vsyncadd [#allocation3], 4294967040  ;;  %v27_v0 = vld [vmem:[#allocation2] sm:$0xff]  ;;  %v28_v1 = vld [vmem:[#allocation2 + $0x8] sm:$0xff]  ;;  %v136_v6 = vmov 0   ;;  %v137_v15 = vmov 1  }
   0xe   :  { %v29_v2 = vadd.f32 %v28_v1, %v27_v0  ;;  %v33_v3 = vmul.f32 %v27_v0, %v27_v0  ;;  %v34_v4 = vmul.f32 %v28_v1, %v28_v1  ;;  %87 = vset.pattern.permute.xlu1 %v136_v6  ;;  %88 = vset.pattern.permute.xlu0 %v137_v15  ;;  %v26_v16 = vld [vmem:[%s165_s1] sm:$0xff]  ;;  %s138_s15 = smov 1   ;;  %s139_s16 = smov [#allocation5]  }
   0xf   :  { %s73_s17 = sshll.u32 %s139_s16, 4  ;;  %s74_s17 = int_to_ptr.vmem [resolvable:$true] %s73_s17 }
  0x10   :  { %30 = vadd.xlane.f32.xlu0 %v29_v2  ;;  %v35_v5 = vadd.f32 %v34_v4, %v33_v3  ;;  %s111_s1 = scalar_lea.vmem %s74_s17, 256  ;;  %p116_p6 = scmp.lt.s32.totalorder %s74_s17, %s74_s17 }
  0x11   :  { %p112_p5 = scmp.ne.s32.totalorder %s74_s17, %s111_s1  ;;  %p117_p7 = scmp.lt.s32.totalorder %s111_s1, %s111_s1 }
  0x13   :  { %p118_p8 = por %p117_p7, %p116_p6 }
  0x14   :  { %36 = vadd.xlane.f32.xlu0 %v35_v5 }
  0x15   :  { %p119_p9 = pnand %p118_p8, %p112_p5 }
  0x99   :  { %v31_v7 = vpop.xlane.xlu0 %30 }
  0x9a   :  { %v32_v8 = vmul.f32 0.00390625, %v31_v7 }
  0x9c   :  { %v39_v10 = vmul.f32 %v32_v8, %v32_v8 }
  0x9d   :  { %v37_v9 = vpop.xlane.xlu0 %36 }
  0x9e   :  { %v38_v11 = vmul.f32 0.00390625, %v37_v9 }
  0xa0   :  { %v40_v12 = vsub.f32 %v38_v11, %v39_v10 }
  0xa2   :  { %v41_v13 = vmax.f32 %v40_v12, 0.0 }
  0xa4   :  { %v42_v14 = vadd.f32 1e-05, %v41_v13 }
  0xa6   :  { %89 = vrsqrt.f32 %v42_v14 }
  0xb3   :  { %v90_v17 = vpop.eup %89 }
  0xb4   :  { %v44_v18 = vmul.f32 %v90_v17, %v26_v16 }
  0xb6   :  { %v45_v19 = vmul.f32 %v44_v18, %v32_v8 }
  0xb8   :  { %47 = vrot.lane.b32.xlu1 %v45_v19, %s138_s15 }
  0xbc   :  { %53 = vperm.xlu1 %87, %v44_v18  }
 0x12a   :  { %v48_v20 = vpop.permute.xlu1 %47 }
 0x12b   :  { %v50_v21 = vsub.f32 %v26_v16, %v48_v20 }
 0x12d   :  { %60 = vperm.xlu0 %88, %v50_v21  }
 0x137   :  { %v54_v22 = vpop.permute.xlu1 %53 }
 0x138   :  { %v56_v23 = vmul.f32 %v54_v22, %v27_v0  ;;  %v57_v24 = vmul.f32 %v54_v22, %v28_v1 }
 0x1a8   :  { %v61_v25 = vpop.permute.xlu0 %60 }
 0x1a9   :  { %v63_v26 = vadd.f32 %v61_v25, %v56_v23  ;;  %v64_v27 = vadd.f32 %v61_v25, %v57_v24 }
 0x1ab   :  { %65 = vst [vmem:[#allocation5] sm:$0xff] %v63_v26  ;;  %66 = vst [vmem:[#allocation5 + $0x8] sm:$0xff] %v64_v27 }
 0x1ac   :  { %122 = shalt.err (!%p119_p9)
}
 0x1ad   :  { %76 = dma.vmem_to_hbm [thread:$0]  %s74_s17, 256, %s166_s2, [#allocation4]  }
 0x1ae   :  { %133 = dma.done.wait [#allocation4], 256  }
 0x1af   :  { %134 = vsyncadd [#allocation4], 4294967040 }
 0x1b0   :  { %80 = vsyncpa [#allocation3], 1 }
 0x1b1   :  { %81 = vsyncpa [#allocation4], 1 }

</bundles_post_ra>
